<compile_context>
chip_gen: v6e
topology: v6e:2x2x1
jax: 0.10.0
libtpu: 0.0.40
codegen_flags: <defaults>
</compile_context>

<pallas_src>
import functools

import jax
import jax.numpy as jnp
from jax.experimental import pallas as pl
from jax.experimental.pallas import tpu as pltpu


# --------------------------------------------------------------------------
# Hardware queries (best effort, always safe fallbacks)
# --------------------------------------------------------------------------

def _num_tensorcores_per_chip():
    """v7x has 2 TensorCores per chip; v5e/v6e have 1.  Conservative fallback 1."""
    try:
        kind = jax.devices()[0].device_kind.lower()
    except Exception:
        return 1
    return 2 if "v7" in kind else 1


def _vmem_capacity_bytes():
    try:
        info = pltpu.get_tpu_info()
        v = getattr(info, "vmem_capacity_bytes", None)
        if isinstance(v, int) and v > 0:
            return v
    except Exception:
        pass
    return 64 * 1024 * 1024  # conservative: v7x per-core VMEM


def _default_block_budget(vmem_capacity):
    # Bigger blocks amortize the ~0.35us per-grid-step overhead; keep the
    # double-buffered total well within the per-core VMEM.
    if vmem_capacity >= 96 * 1024 * 1024:   # v5e / v6e (128 MiB physical VMEM)
        return 12 * 1024 * 1024
    return 8 * 1024 * 1024                  # v7x (64 MiB physical VMEM)


# --------------------------------------------------------------------------
# Tiling decisions
# --------------------------------------------------------------------------

def _largest_divisor_leq(n, cap):
    cap = int(max(1, min(n, cap)))
    for d in range(cap, 0, -1):
        if n % d == 0:
            return d
    return 1


def _choose_tiles(B, C, L, itemsize, budget_bytes, num_cores):
    """Pick (TB, TL) so one x block stays within `budget_bytes` (double-buffered
    by Pallas), TB divides B and TL divides L (so padded tails never pollute the
    running sum/max).  Prefer full-L blocks (fully contiguous DMAs)."""
    row_bytes = C * L * itemsize  # one batch element, full sequence
    if row_bytes <= budget_bytes:
        tl = L
        tb = _largest_divisor_leq(B, budget_bytes // row_bytes)
        # Multi-TensorCore chips (v7x): make the batch grid axis a multiple of
        # the core count so CORE_PARALLEL gives each core equal work.  On
        # single-core chips (v5e/v6e) keep the block as large as possible —
        # splitting it would just add grid steps with no parallelism benefit.
        if num_cores > 1:
            while tb > 1 and (B // tb) % num_cores != 0:
                tb = _largest_divisor_leq(B, tb - 1)
    else:
        # Long sequences: one batch element per step, tile L with a divisor
        # that is a multiple of 128 (lane aligned).  Enforce a minimum
        # contiguous chunk of ~2 KiB per channel row (TL >= 512 f32 / 1024
        # bf16); if the budget would push TL below that, effectively raise the
        # budget instead of shrinking TL.
        tb = 1
        min_tl = max(128, ((2048 // itemsize) // 128) * 128)
        cap = max(min_tl, ((budget_bytes // (C * itemsize)) // 128) * 128)
        tl = None
        d = cap
        while d >= min_tl:
            if L % d == 0:
                tl = d
                break
            d -= 128
        if tl is None:
            tl = _largest_divisor_leq(L, cap)
            if tl < min_tl:
                # TODO(synk): masked tail handling for L with no usable divisor;
                # fall back to the full sequence (may exceed the VMEM budget).
                tl = L
    return tb, tl


def _choose_chunk(tb, C, tl, itemsize):
    """Sequence chunk (lanes) for the fused in-kernel sum/max pass: ~256 KiB of
    loaded data per chunk (a few dozen vregs), a multiple of 128 lanes, and an
    exact divisor of the tile (no tails)."""
    if tl <= 512:
        return tl
    row_bytes = max(1, tb * C * itemsize)       # bytes per sequence position
    target = max(128, min(tl, ((256 * 1024) // row_bytes // 128) * 128))
    d = target
    while d >= 128:
        if tl % d == 0:
            return d
        d -= 128
    return tl  # no aligned divisor: single fused pass over the whole tile


def _derived_vmem_limit(x_block_bytes, param_bytes, out_block_bytes,
                        scratch_bytes, capacity):
    # 2 pipeline buffers for x and the output block, 2 for the (constant-index)
    # weights/biases, plus accumulator scratch, plus compiler headroom.
    used = 2 * x_block_bytes + 2 * param_bytes + 2 * out_block_bytes + scratch_bytes
    limit = used + 8 * 1024 * 1024                       # headroom
    limit = max(limit, 32 * 1024 * 1024)                 # never below the default
    limit = min(limit, max(32 * 1024 * 1024, capacity - 8 * 1024 * 1024))
    return int(limit)


# --------------------------------------------------------------------------
# Kernel
# --------------------------------------------------------------------------

def channel_mask_kernel(x_ref, w1t_ref, b1_ref, w2t_ref, b2_ref, o_ref,
                        sum_acc, max_acc, *, inv_l, tb, tl, chunk):
    # x_ref:   (TB, C, TL) block, native dtype
    # w1t_ref: (C, S), b1_ref: (1, S), w2t_ref: (S, C), b2_ref: (1, C)
    # o_ref:   (1, TB, C) block (lane-dense: C on the lane axis)
    # sum_acc / max_acc: (TB, C) f32 VMEM scratch, persistent across the L axis
    il = pl.program_id(1)

    @pl.when(il == 0)
    def _():
        sum_acc[...] = jnp.zeros_like(sum_acc)
        max_acc[...] = jnp.full_like(max_acc, -jnp.inf)

    # Fused single-pass reduction: each chunk of the sequence tile is loaded
    # from VMEM exactly once and feeds BOTH accumulators.
    def reduce_chunk(start):
        xc = x_ref[:, :, pl.ds(start, chunk)]                       # (TB, C, chunk)
        sum_acc[...] += jnp.sum(xc, axis=-1, dtype=jnp.float32)
        max_acc[...] = jnp.maximum(max_acc[...],
                                   jnp.max(xc, axis=-1).astype(jnp.float32))

    n_chunks = tl // chunk
    if n_chunks <= 8:
        # Short fixed trip count: fully unrolled at trace time (static slices).
        for j in range(n_chunks):
            reduce_chunk(j * chunk)
    else:
        def body(j, carry):
            reduce_chunk(pl.multiple_of(j * chunk, chunk))
            return carry
        jax.lax.fori_loop(0, n_chunks, body, 0)

    @pl.when(il == pl.num_programs(1) - 1)
    def _():
        avg_p = sum_acc[...] * inv_l                                # (TB, C)
        max_p = max_acc[...]                                        # (TB, C)
        # Fused MLP: one (2*TB, C) x (C, S) matmul instead of 4 N=1 matmuls.
        # (Epilogue is noise relative to streaming x, so it stays on the MXU.)
        p = jnp.concatenate([avg_p, max_p], axis=0)                 # (2*TB, C)
        h = jnp.dot(p, w1t_ref[...],
                    preferred_element_type=jnp.float32) + b1_ref[...]
        h = jnp.maximum(h, 0.0)                                     # ReLU
        y = jnp.dot(h, w2t_ref[...],
                    preferred_element_type=jnp.float32) + b2_ref[...]
        # Each row of y carries b2, so avg-half + max-half carries 2*b2,
        # exactly matching mlp(avg_pool) + mlp(max_pool).
        z = y[:tb] + y[tb:]                                         # (TB, C)
        o_ref[0] = jax.nn.sigmoid(z).astype(o_ref.dtype)


# --------------------------------------------------------------------------
# Wrapper
# --------------------------------------------------------------------------

def channel_mask(x, w1, b1, w2, b2, *, block_budget_bytes=None):
    B, C, L = x.shape
    S = w1.shape[0]
    itemsize = x.dtype.itemsize

    num_cores = _num_tensorcores_per_chip()
    vmem_cap = _vmem_capacity_bytes()
    if block_budget_bytes is None:
        block_budget_bytes = _default_block_budget(vmem_cap)

    tb, tl = _choose_tiles(B, C, L, itemsize, block_budget_bytes, num_cores)
    n_bt, n_lt = B // tb, L // tl
    chunk = _choose_chunk(tb, C, tl, itemsize)

    # Pre-transpose weights / flatten biases outside the kernel (tiny, one-off).
    w1t = jnp.transpose(w1)          # (C, S)
    w2t = jnp.transpose(w2)          # (S, C)
    b1r = jnp.reshape(b1, (1, S))
    b2r = jnp.reshape(b2, (1, C))

    # Derive the VMEM limit from actual usage instead of a flat number.
    x_block_bytes = tb * C * tl * itemsize
    param_bytes = (C * S + S + S * C + C) * 4
    out_block_bytes = tb * C * itemsize
    scratch_bytes = 2 * tb * C * 4
    vmem_limit = _derived_vmem_limit(x_block_bytes, param_bytes, out_block_bytes,
                                     scratch_bytes, vmem_cap)

    # Engage both v7x TensorCores on the batch axis when the grid allows it.
    use_core_parallel = (num_cores > 1 and n_bt >= num_cores
                         and n_bt % num_cores == 0)
    if use_core_parallel:
        dim_sems = (pltpu.CORE_PARALLEL, pltpu.ARBITRARY)
    else:
        dim_sems = ("parallel", "arbitrary")

    kernel = functools.partial(channel_mask_kernel, inv_l=1.0 / L,
                               tb=tb, tl=tl, chunk=chunk)

    out3d = pl.pallas_call(
        kernel,
        out_shape=jax.ShapeDtypeStruct((n_bt, tb, C), x.dtype),
        grid_spec=pltpu.PrefetchScalarGridSpec(
            num_scalar_prefetch=0,
            grid=(n_bt, n_lt),                      # reduction axis (L) last
            in_specs=[
                pl.BlockSpec((tb, C, tl), lambda ib, il: (ib, 0, il)),
                pl.BlockSpec((C, S), lambda ib, il: (0, 0)),
                pl.BlockSpec((1, S), lambda ib, il: (0, 0)),
                pl.BlockSpec((S, C), lambda ib, il: (0, 0)),
                pl.BlockSpec((1, C), lambda ib, il: (0, 0)),
            ],
            out_specs=pl.BlockSpec((1, tb, C), lambda ib, il: (ib, 0, 0)),
            scratch_shapes=[
                pltpu.VMEM((tb, C), jnp.float32),   # running sum
                pltpu.VMEM((tb, C), jnp.float32),   # running max
            ],
        ),
        compiler_params=pltpu.CompilerParams(
            dimension_semantics=dim_sems,
            vmem_limit_bytes=vmem_limit,
        ),
    )(x, w1t, b1r, w2t, b2r)

    return out3d.reshape(B, C, 1)


def channel_mask_ref(x, w1, b1, w2, b2):
    # Pure-JAX reference mirroring the PyTorch forward.
    avg_p = jnp.mean(x, axis=2, keepdims=True)   # (B, C, 1)
    max_p = jnp.max(x, axis=2, keepdims=True)    # (B, C, 1)

    def mlp(v):  # v: (B, C, 1)
        h = jnp.einsum("sc,bcl->bsl", w1, v) + b1[None, :, :]
        h = jnp.maximum(h, 0.0)
        return jnp.einsum("cs,bsl->bcl", w2, h) + b2[None, :, :]

    return jax.nn.sigmoid(mlp(avg_p) + mlp(max_p))


if __name__ == "__main__":
    B, C, L = 2, 16, 128
    ratio = 8
    S = C // ratio  # squeeze_size = 2

    key = jax.random.PRNGKey(0)
    kx, k1, k2, k3, k4 = jax.random.split(key, 5)

    x = jax.random.normal(kx, (B, C, L), dtype=jnp.float32)
    # Conv1d(kernel_size=1) weights flattened to 2-D linear maps (+ bias).
    w1 = jax.random.normal(k1, (S, C), dtype=jnp.float32) * 0.2   # fc1.weight[:, :, 0]
    b1 = jax.random.normal(k2, (S, 1), dtype=jnp.float32) * 0.1   # fc1.bias
    w2 = jax.random.normal(k3, (C, S), dtype=jnp.float32) * 0.2   # fc2.weight[:, :, 0]
    b2 = jax.random.normal(k4, (C, 1), dtype=jnp.float32) * 0.1   # fc2.bias

    out = channel_mask(x, w1, b1, w2, b2)
    out = jax.block_until_ready(out)

    ref = channel_mask_ref(x, w1, b1, w2, b2)
    assert out.shape == (B, C, 1), out.shape
    assert jnp.allclose(out, ref, atol=1e-5, rtol=1e-5), (
        float(jnp.max(jnp.abs(out - ref))))

    print("KERNEL_OK")
</pallas_src>

<mosaic_0001>
module attributes {stable_mosaic.version = 11 : i64} {
  func.func @channel_mask_kernel(%arg0: i32, %arg1: i32, %arg2: memref<2x16x128xf32, #tpu.memory_space<vmem>>, %arg3: memref<16x2xf32, #tpu.memory_space<vmem>>, %arg4: memref<1x2xf32, #tpu.memory_space<vmem>>, %arg5: memref<2x16xf32, #tpu.memory_space<vmem>>, %arg6: memref<1x16xf32, #tpu.memory_space<vmem>>, %arg7: memref<1x2x16xf32, #tpu.memory_space<vmem>>, %arg8: memref<2x16xf32, #tpu.memory_space<vmem>>, %arg9: memref<2x16xf32, #tpu.memory_space<vmem>>) attributes {dimension_semantics = [#tpu.dimension_semantics<parallel>, #tpu.dimension_semantics<arbitrary>], iteration_bounds = array<i64: 1, 1>, scalar_prefetch = 0 : i64, scratch_operands = 2 : i64, tpu.core_type = #tpu.core_type<tc>, window_params = [{transform_indices = @transform_0, window_bounds = array<i64: 2, 16, 128>}, {pipeline_mode = #tpu.pipeline_mode<synchronous>, transform_indices = @transform_1, window_bounds = array<i64: 16, 2>}, {pipeline_mode = #tpu.pipeline_mode<synchronous>, transform_indices = @transform_2, window_bounds = array<i64: 1, 2>}, {pipeline_mode = #tpu.pipeline_mode<synchronous>, transform_indices = @transform_3, window_bounds = array<i64: 2, 16>}, {pipeline_mode = #tpu.pipeline_mode<synchronous>, transform_indices = @transform_4, window_bounds = array<i64: 1, 16>}, {transform_indices = @transform_5, window_bounds = array<i64: 1, 2, 16>}]} {
    %c0_i32 = arith.constant 0 : i32
    %0 = arith.cmpi eq, %arg1, %c0_i32 : i32
    %1 = arith.extui %0 : i1 to i32
    %c0_i32_0 = arith.constant 0 : i32
    %2 = arith.cmpi ne, %1, %c0_i32_0 : i32
    scf.if %2 {
      %cst_14 = arith.constant 0.000000e+00 : f32
      %15 = vector.broadcast %cst_14 : f32 to vector<2x16xf32>
      %c0_15 = arith.constant 0 : index
      %c0_16 = arith.constant 0 : index
      %16 = vector.load %arg8[%c0_15, %c0_16] : memref<2x16xf32, #tpu.memory_space<vmem>>, vector<2x16xf32>
      tpu.vector_store %arg8[%c0_15, %c0_16], %15 {strides = array<i32>} : memref<2x16xf32, #tpu.memory_space<vmem>>, vector<2x16xf32>,
      %cst_17 = arith.constant 0xFF800000 : f32
      %17 = vector.broadcast %cst_17 : f32 to vector<2x16xf32>
      %c0_18 = arith.constant 0 : index
      %c0_19 = arith.constant 0 : index
      %18 = vector.load %arg9[%c0_18, %c0_19] : memref<2x16xf32, #tpu.memory_space<vmem>>, vector<2x16xf32>
      tpu.vector_store %arg9[%c0_18, %c0_19], %17 {strides = array<i32>} : memref<2x16xf32, #tpu.memory_space<vmem>>, vector<2x16xf32>,
    } else {
    }
    %c0 = arith.constant 0 : index
    %c0_1 = arith.constant 0 : index
    %c0_2 = arith.constant 0 : index
    %3 = vector.load %arg2[%c0, %c0_1, %c0_2] : memref<2x16x128xf32, #tpu.memory_space<vmem>>, vector<2x16x128xf32>
    %c0_3 = arith.constant 0 : index
    %c0_4 = arith.constant 0 : index
    %4 = vector.load %arg8[%c0_3, %c0_4] : memref<2x16xf32, #tpu.memory_space<vmem>>, vector<2x16xf32>
    %cst = arith.constant dense<0.000000e+00> : vector<2x16xf32>
    %5 = vector.multi_reduction <add>, %3, %cst [2] : vector<2x16x128xf32> to vector<2x16xf32>
    %6 = arith.addf %4, %5 : vector<2x16xf32>
    %c0_5 = arith.constant 0 : index
    %c0_6 = arith.constant 0 : index
    %7 = vector.load %arg8[%c0_5, %c0_6] : memref<2x16xf32, #tpu.memory_space<vmem>>, vector<2x16xf32>
    tpu.vector_store %arg8[%c0_5, %c0_6], %6 {strides = array<i32>} : memref<2x16xf32, #tpu.memory_space<vmem>>, vector<2x16xf32>,
    %c0_7 = arith.constant 0 : index
    %c0_8 = arith.constant 0 : index
    %8 = vector.load %arg9[%c0_7, %c0_8] : memref<2x16xf32, #tpu.memory_space<vmem>>, vector<2x16xf32>
    %cst_9 = arith.constant dense<0xFF800000> : vector<2x16xf32>
    %9 = vector.multi_reduction <maximumf>, %3, %cst_9 [2] : vector<2x16x128xf32> to vector<2x16xf32>
    %10 = arith.maximumf %8, %9 : vector<2x16xf32>
    %c0_10 = arith.constant 0 : index
    %c0_11 = arith.constant 0 : index
    %11 = vector.load %arg9[%c0_10, %c0_11] : memref<2x16xf32, #tpu.memory_space<vmem>>, vector<2x16xf32>
    tpu.vector_store %arg9[%c0_10, %c0_11], %10 {strides = array<i32>} : memref<2x16xf32, #tpu.memory_space<vmem>>, vector<2x16xf32>,
    %c0_i32_12 = arith.constant 0 : i32
    %12 = arith.cmpi eq, %arg1, %c0_i32_12 : i32
    %13 = arith.extui %12 : i1 to i32
    %c0_i32_13 = arith.constant 0 : i32
    %14 = arith.cmpi ne, %13, %c0_i32_13 : i32
    scf.if %14 {
      %c0_14 = arith.constant 0 : index
      %c0_15 = arith.constant 0 : index
      %15 = vector.load %arg8[%c0_14, %c0_15] : memref<2x16xf32, #tpu.memory_space<vmem>>, vector<2x16xf32>
      %cst_16 = arith.constant 7.812500e-03 : f32
      %16 = vector.broadcast %cst_16 : f32 to vector<2x16xf32>
      %17 = arith.mulf %15, %16 : vector<2x16xf32>
      %c0_17 = arith.constant 0 : index
      %c0_18 = arith.constant 0 : index
      %18 = vector.load %arg9[%c0_17, %c0_18] : memref<2x16xf32, #tpu.memory_space<vmem>>, vector<2x16xf32>
      %19 = tpu.concatenate %17, %18 in 0 : vector<2x16xf32>, vector<2x16xf32> -> vector<4x16xf32>
      %c0_19 = arith.constant 0 : index
      %c0_20 = arith.constant 0 : index
      %20 = vector.load %arg3[%c0_19, %c0_20] : memref<16x2xf32, #tpu.memory_space<vmem>>, vector<16x2xf32>
      %cst_21 = arith.constant dense<0.000000e+00> : vector<4x2xf32>
      %21 = tpu.matmul %19, %20, %cst_21 {dimension_numbers = #tpu.dot_dimension_numbers<[1], [0], [0], [1], [0, 0, 1, 1], [], []>} : vector<4x16xf32>, vector<16x2xf32>, vector<4x2xf32> -> vector<4x2xf32>
      %c0_22 = arith.constant 0 : index
      %c0_23 = arith.constant 0 : index
      %22 = vector.load %arg4[%c0_22, %c0_23] : memref<1x2xf32, #tpu.memory_space<vmem>>, vector<1x2xf32>
      %23 = vector.broadcast %22 : vector<1x2xf32> to vector<4x2xf32>
      %24 = arith.addf %21, %23 : vector<4x2xf32>
      %cst_24 = arith.constant 0.000000e+00 : f32
      %25 = vector.broadcast %cst_24 : f32 to vector<4x2xf32>
      %26 = arith.maximumf %24, %25 : vector<4x2xf32>
      %c0_25 = arith.constant 0 : index
      %c0_26 = arith.constant 0 : index
      %27 = vector.load %arg5[%c0_25, %c0_26] : memref<2x16xf32, #tpu.memory_space<vmem>>, vector<2x16xf32>
      %cst_27 = arith.constant dense<0.000000e+00> : vector<4x16xf32>
      %28 = tpu.matmul %26, %27, %cst_27 {dimension_numbers = #tpu.dot_dimension_numbers<[1], [0], [0], [1], [0, 0, 1, 1], [], []>} : vector<4x2xf32>, vector<2x16xf32>, vector<4x16xf32> -> vector<4x16xf32>
      %c0_28 = arith.constant 0 : index
      %c0_29 = arith.constant 0 : index
      %29 = vector.load %arg6[%c0_28, %c0_29] : memref<1x16xf32, #tpu.memory_space<vmem>>, vector<1x16xf32>
      %30 = vector.broadcast %29 : vector<1x16xf32> to vector<4x16xf32>
      %31 = arith.addf %28, %30 : vector<4x16xf32>
      %32 = vector.extract_strided_slice %31 {offsets = [0, 0], sizes = [2, 16], strides = [1, 1]} : vector<4x16xf32> to vector<2x16xf32>
      %33 = vector.extract_strided_slice %31 {offsets = [2, 0], sizes = [2, 16], strides = [1, 1]} : vector<4x16xf32> to vector<2x16xf32>
      %34 = arith.addf %32, %33 : vector<2x16xf32>
      %35 = arith.negf %34 : vector<2x16xf32>
      %36 = math.exp %35 : vector<2x16xf32>
      %cst_30 = arith.constant 1.000000e+00 : f32
      %37 = vector.broadcast %cst_30 : f32 to vector<2x16xf32>
      %38 = arith.addf %37, %36 : vector<2x16xf32>
      %39 = arith.divf %37, %38 : vector<2x16xf32>
      %c0_31 = arith.constant 0 : index
      %c0_32 = arith.constant 0 : index
      %c0_33 = arith.constant 0 : index
      %40 = vector.load %arg7[%c0_31, %c0_32, %c0_33] : memref<1x2x16xf32, #tpu.memory_space<vmem>>, vector<1x2x16xf32>
      %41 = vector.shape_cast %40 : vector<1x2x16xf32> to vector<2x16xf32>
      %42 = vector.shape_cast %39 : vector<2x16xf32> to vector<1x2x16xf32>
      tpu.vector_store %arg7[%c0_31, %c0_32, %c0_33], %42 {strides = array<i32>} : memref<1x2x16xf32, #tpu.memory_space<vmem>>, vector<1x2x16xf32>,
    } else {
    }
    return
  }
  func.func @transform_0(%arg0: i32, %arg1: i32) -> (i32, i32, i32) {
    %c0_i32 = arith.constant 0 : i32
    %c0_i32_0 = arith.constant 0 : i32
    return %arg0, %c0_i32, %arg1 : i32, i32, i32
  }
  func.func @transform_1(%arg0: i32, %arg1: i32) -> (i32, i32) {
    %c0_i32 = arith.constant 0 : i32
    %c0_i32_0 = arith.constant 0 : i32
    %c0_i32_1 = arith.constant 0 : i32
    return %c0_i32, %c0_i32_0 : i32, i32
  }
  func.func @transform_2(%arg0: i32, %arg1: i32) -> (i32, i32) {
    %c0_i32 = arith.constant 0 : i32
    %c0_i32_0 = arith.constant 0 : i32
    %c0_i32_1 = arith.constant 0 : i32
    return %c0_i32, %c0_i32_0 : i32, i32
  }
  func.func @transform_3(%arg0: i32, %arg1: i32) -> (i32, i32) {
    %c0_i32 = arith.constant 0 : i32
    %c0_i32_0 = arith.constant 0 : i32
    %c0_i32_1 = arith.constant 0 : i32
    return %c0_i32, %c0_i32_0 : i32, i32
  }
  func.func @transform_4(%arg0: i32, %arg1: i32) -> (i32, i32) {
    %c0_i32 = arith.constant 0 : i32
    %c0_i32_0 = arith.constant 0 : i32
    %c0_i32_1 = arith.constant 0 : i32
    return %c0_i32, %c0_i32_0 : i32, i32
  }
  func.func @transform_5(%arg0: i32, %arg1: i32) -> (i32, i32, i32) {
    %c0_i32 = arith.constant 0 : i32
    %c0_i32_0 = arith.constant 0 : i32
    %c0_i32_1 = arith.constant 0 : i32
    return %arg0, %c0_i32, %c0_i32_0 : i32, i32, i32
  }
}

</mosaic_0001>

<bundles_post_ra>
// kernel: tpu_custom_call.1
= control target key start
LH: loop header
LB: loop body
LE: loop exit
PB: predicated region body
PF: predicated region fallthrough
CT: control target
= control target key end

     0   :  { %10 = vsyncpa [#allocation5], 0  ;;  %s475_s0 = inlined_call_operand.hbm [shape: f32[2,16,128], index: 0, kind: input, shape index: {}]   ;;  %s476_s1 = inlined_call_operand.vmem [shape: f32[16,2], index: 1, kind: input, shape index: {}]   ;;  %s477_s2 = inlined_call_operand.vmem [shape: f32[1,2], index: 2, kind: input, shape index: {}]   ;;  %s478_s3 = inlined_call_operand.vmem [shape: f32[2,16], index: 3, kind: input, shape index: {}]   ;;  %s479_s4 = inlined_call_operand.vmem [shape: f32[1,16], index: 4, kind: input, shape index: {}]   ;;  %s480_s5 = inlined_call_operand.hbm [shape: f32[1,2,16], index: 5, kind: output, shape index: {}]  }
   0x1   :  { %11 = vsyncpa [#allocation6], 0  ;;  %s406_s18 = smov [#allocation4]  }
   0x2   :  { %s17_s19 = sshll.u32 %s406_s18, 4  ;;  %s18_s19 = int_to_ptr.vmem [resolvable:$true] %s17_s19 }
   0x3   :  { %s370_s20 = scalar_lea.vmem %s18_s19, 512  ;;  %p375_p1 = scmp.lt.s32.totalorder %s18_s19, %s18_s19 }
   0x4   :  { %p371_p0 = scmp.ne.s32.totalorder %s18_s19, %s370_s20  ;;  %p376_p2 = scmp.lt.s32.totalorder %s370_s20, %s370_s20 }
   0x6   :  { %p377_p3 = por %p376_p2, %p375_p1 }
   0x8   :  { %p378_p4 = pnand %p377_p3, %p371_p0 }
   0xa   :  { %381 = shalt.err (!%p378_p4)
}
   0xb   :  { %s407_s21 = smov 128   ;;  %s408_s22 = smov 8  }
   0xc   :  { %23 = dma.hbm_to_vmem [thread:$0]  %s475_s0, 512, %s18_s19, [#allocation5], %s407_s21, %s407_s21, %s408_s22  }
   0xd   :  { %402 = dma.done.wait [#allocation5], 512  }
   0xe   :  { %403 = vsyncadd [#allocation5], 4294966784  ;;  %v44_v0 = vld [vmem:[#allocation4 + $0x10] sm:$0xff]  ;;  %v42_v1 = vld [vmem:[#allocation4] sm:$0xff]  ;;  %vm39_vm0 = vcmask 123904   ;;  %v409_v4 = vmov 0.0   ;;  %v59_v8 = vlaneseq }
   0xf   :  { %51 = vadd.xlane.f32.xlu1 %v44_v0  ;;  %47 = vadd.xlane.f32.xlu0 %v42_v1  ;;  %v45_v2 = vld [vmem:[#allocation4 + $0x18] sm:$0xff]  ;;  %v43_v3 = vld [vmem:[#allocation4 + $0x8] sm:$0xff]  ;;  %40 = vst.msk [vmem:[#allocation2] sm:$0x3] %vm39_vm0, %v409_v4  ;;  %v410_v5 = vmov -inf   ;;  %vm411_vm1 = vmmov 0  }
  0x10   :  { %339 = vmatprep.subr.mxu0 %v409_v4  ;;  %346 = vmatprep.subr.mxu1 %v409_v4  ;;  %41 = vst.msk [vmem:[#allocation3] sm:$0x3] %vm39_vm0, %v410_v5  ;;  %v134_v6 = vld [vmem:[%s476_s1 + $0x8] sm:$0xff]  ;;  %v133_v7 = vld [vmem:[%s476_s1] sm:$0xff]  ;;  %v60_v9 = vand.u32 127, %v59_v8  ;;  %v62_v10 = vshrl.u32 %v59_v8, 7 }
  0x11   :  { %340 = vmatpush3.msra.mxu0 %v134_v6  ;;  %343 = vmatprep.mubr.msk.f32.mxu0 %vm411_vm1, %v409_v4  ;;  %vm70_vm2 = vcmask 130112   ;;  %vm81_vm3 = vcmask 1041409   ;;  %vm131_vm4 = vcmask 1041408   ;;  %vm142_vm5 = vcmask 130048   ;;  %v217_v45 = vld [vmem:[%s478_s3] sm:$0x3] }
  0x12   :  { %341 = vmatprep.subr.mxu0 %v409_v4  ;;  %348 = vmatprep.mubr.msk.f32.mxu1 %vm411_vm1, %v409_v4  ;;  %v65_v11 = vadd.s32 4294967288, %v60_v9  ;;  %v63_v14 = vsub.s32 %v60_v9, %v62_v10  ;;  %v328_v46 = vld [vmem:[%s477_s2] ss:$0 sm:$0xff]  ;;  %vm225_vm6 = vcmask 15360   ;;  %s412_s2 = smov [#allocation7]  }
  0x13   :  { %53 = vadd.xlane.f32.xlu1 %v45_v2  ;;  %49 = vadd.xlane.f32.xlu0 %v43_v3  ;;  %v330_v51 = vld [vmem:[%s479_s4] ss:$0 sm:$0xff]  ;;  %s319_s3 = sshll.u32 %s412_s2, 4  ;;  %s320_s3 = int_to_ptr.vmem [resolvable:$true] %s319_s3 }
  0x14   :  { %342 = vmatpush3.msra.mxu0 %v133_v7  ;;  %v68_v15 = vsub.s32 %v65_v11, %v62_v10  ;;  %347 = vmatpush3.msk.msra.mxu1 %vm131_vm4, %v217_v45  ;;  %s382_s8 = scalar_lea.vmem %s320_s3, 32  ;;  %p387_p6 = scmp.lt.s32.totalorder %s320_s3, %s320_s3 }
  0x15   :  { %p383_p5 = scmp.ne.s32.totalorder %s320_s3, %s382_s8  ;;  %p388_p7 = scmp.lt.s32.totalorder %s382_s8, %s382_s8 }
  0x16   :  { %v46_v22 = vld [vmem:[#allocation2] sm:$0x3] }
  0x17   :  { %90 = vmax.xlane.f32.xlu1 %v43_v3  ;;  %88 = vmax.xlane.f32.xlu0 %v42_v1  ;;  %v87_v35 = vld [vmem:[#allocation3] sm:$0x3]  ;;  %p389_p8 = por %p388_p7, %p387_p6 }
  0x19   :  { %p390_p9 = pnand %p389_p8, %p383_p5 }
  0x1b   :  { %94 = vmax.xlane.f32.xlu1 %v45_v2  ;;  %92 = vmax.xlane.f32.xlu0 %v44_v0 }
  0x98   :  { %v52_v12 = vpop.xlane.xlu1 %51  ;;  %v48_v13 = vpop.xlane.xlu0 %47 }
  0x99   :  { %v75_v18 = vrot.slane %v52_v12, %v63_v14  ;;  %v64_v19 = vrot.slane %v48_v13, %v63_v14 }
  0x9c   :  { %v54_v16 = vpop.xlane.xlu1 %53  ;;  %v50_v17 = vpop.xlane.xlu0 %49 }
  0x9d   :  { %v79_v20 = vrot.slane %v54_v16, %v68_v15  ;;  %v69_v21 = vrot.slane %v50_v17, %v68_v15 }
  0x9f   :  { %v80_v23 = vsel %vm70_vm2, %v79_v20, %v75_v18  ;;  %v71_v24 = vsel %vm70_vm2, %v69_v21, %v64_v19 }
  0xa0   :  { %v82_v25 = vsel %vm81_vm3, %v80_v23, %v71_v24  ;;  %v91_v26 = vpop.xlane.xlu1 %90  ;;  %v89_v27 = vpop.xlane.xlu0 %88 }
  0xa1   :  { %v84_v28 = vadd.f32 %v82_v25, %v46_v22  ;;  %v107_v29 = vrot.slane %v91_v26, %v68_v15  ;;  %v103_v30 = vrot.slane %v89_v27, %v63_v14 }
  0xa3   :  { %86 = vst.msk [vmem:[#allocation2] sm:$0x3] %vm39_vm0, %v84_v28  ;;  %v108_v36 = vsel %vm70_vm2, %v107_v29, %v103_v30 }
  0xa4   :  { %v95_v31 = vpop.xlane.xlu1 %94  ;;  %v93_v32 = vpop.xlane.xlu0 %92 }
  0xa5   :  { %v116_v33 = vrot.slane %v95_v31, %v68_v15  ;;  %v112_v34 = vrot.slane %v93_v32, %v63_v14 }
  0xa7   :  { %v117_v37 = vsel %vm70_vm2, %v116_v33, %v112_v34 }
  0xa8   :  { %v118_v38 = vsel %vm81_vm3, %v117_v37, %v108_v36 }
  0xa9   :  { %v120_v39 = vmax.f32 %v87_v35, %v118_v38 }
  0xaa   :  { %v125_v40 = vld [vmem:[#allocation2] sm:$0x3] }
  0xab   :  { %121 = vst.msk [vmem:[#allocation3] sm:$0x3] %vm39_vm0, %v120_v39  ;;  %v126_v42 = vmul.f32 0.0078125, %v125_v40 }
  0xb2   :  { %v127_v41 = vld [vmem:[#allocation3] sm:$0x3] }
  0xb3   :  { %v129_v43 = vrot.slane %v127_v41, 6 }
  0xb5   :  { %v132_v44 = vsel %vm131_vm4, %v126_v42, %v129_v43 }
  0xb6   :  { %344 = vmatmul.mubr.msk.f32.vlgmr.msra.gmra.mxu0 %vm142_vm5, %v132_v44 }
 0x176   :  { %v212_v47 = vpop.f32.mrf.mxu0 }
 0x177   :  { %v213_v48 = vadd.f32 %v328_v46, %v212_v47 }
 0x178   :  { %v345_v49 = vpop.f32.mrf.mxu0 }
 0x179   :  { %v216_v50 = vmax.f32 %v213_v48, 0.0 }
 0x17b   :  { %349 = vmatmul.mubr.msk.f32.vlgmr.msra.gmra.mxu1 %vm225_vm6, %v216_v50 }
 0x23b   :  { %v298_v52 = vpop.f32.mrf.mxu1 }
 0x23c   :  { %v299_v53 = vadd.f32 %v330_v51, %v298_v52 }
 0x23d   :  { %v350_v54 = vpop.f32.mrf.mxu1 }
 0x23e   :  { %v303_v55 = vrot.slane %v299_v53, 2 }
 0x240   :  { %v305_v56 = vadd.f32 %v303_v55, %v299_v53 }
 0x242   :  { %v333_v57 = vmul.f32 -1.442695, %v305_v56 }
 0x244   :  { %358 = vpow2.f32 %v333_v57 }
 0x251   :  { %v359_v58 = vpop.eup %358 }
 0x252   :  { %v309_v59 = vadd.f32 1.0, %v359_v58 }
 0x254   :  { %360 = vrcp.f32 %v309_v59 }
 0x261   :  { %v361_v60 = vpop.eup %360 }
 0x262   :  { %312 = vst.msk [vmem:[#allocation7] sm:$0x3] %vm39_vm0, %v361_v60 }
 0x263   :  { %393 = shalt.err (!%p390_p9)
}
 0x264   :  { %322 = dma.vmem_to_hbm [thread:$0]  %s320_s3, 32, %s480_s5, [#allocation6]  }
 0x265   :  { %404 = dma.done.wait [#allocation6], 32  }
 0x266   :  { %405 = vsyncadd [#allocation6], 4294967264 }
 0x267   :  { %326 = vsyncpa [#allocation5], 1 }
 0x268   :  { %327 = vsyncpa [#allocation6], 1 }

</bundles_post_ra>
